<compile_context>
chip_gen: v7x
topology: tpu7x:2x2x1
jax: 0.10.0
libtpu: 0.0.40
codegen_flags: <defaults>
</compile_context>

<pallas_src>
import functools

import jax
import jax.numpy as jnp
from jax.experimental import pallas as pl
from jax.experimental.pallas import tpu as pltpu

EPS = 1e-5  # nn.BatchNorm2d default


def _residual_block_kernel(x_ref, su_ref, sd_ref, w1_ref, w2_ref, q_ref,
                           g1_ref, b1_ref, g2_ref, b2_ref, o_ref, *, nhw):
    """Fused conv-bn-relu-conv-bn-add-relu on a lane-dense (N*H, W*C) layout."""
    x = x_ref[...]                       # (NH, WC) f32, lane-dense
    s_up = su_ref[...]                   # (NH, NH) row-shift: picks row h-1, 0 at image top
    s_dn = sd_ref[...]                   # (NH, NH) row-shift: picks row h+1, 0 at image bottom
    q = q_ref[...]                       # (WC, WC) 0/1 per-channel lane pooling (P @ P.T)
    inv_cnt = 1.0 / nhw                  # 1 / (N*H*W) for BN batch statistics

    def conv3x3(inp, w_ref):
        # 3x3 "same" conv of the whole batch as 3 banded-block MXU matmuls (K = W*C).
        shifted = (
            jnp.dot(s_up, inp, preferred_element_type=jnp.float32),   # vertical tap kh=0
            inp,                                                      # kh=1
            jnp.dot(s_dn, inp, preferred_element_type=jnp.float32),   # kh=2
        )
        acc = None
        for kh in range(3):
            part = jnp.dot(shifted[kh].astype(jnp.bfloat16), w_ref[kh],
                           preferred_element_type=jnp.float32)
            acc = part if acc is None else acc + part
        return acc

    def batchnorm(z, g_ref, b_ref):
        # Training-mode BN: biased batch stats over (N, H, W) per channel.
        # Channel pooling runs on the idle MXU via `q`; the result arrives already
        # broadcast across every lane belonging to that channel.
        sum_wc = jnp.sum(jnp.dot(z, q, preferred_element_type=jnp.float32),
                         axis=0, keepdims=True)                      # (1, WC)
        sq_wc = jnp.sum(jnp.dot(z * z, q, preferred_element_type=jnp.float32),
                        axis=0, keepdims=True)                       # (1, WC)
        mean = sum_wc * inv_cnt
        var = sq_wc * inv_cnt - mean * mean                          # biased variance
        scale = g_ref[...] * jax.lax.rsqrt(var + EPS)                # (1, WC)
        shift = b_ref[...] - mean * scale
        return z * scale + shift

    y1 = jnp.maximum(batchnorm(conv3x3(x, w1_ref), g1_ref, b1_ref), 0.0)
    y2 = batchnorm(conv3x3(y1, w2_ref), g2_ref, b2_ref)
    o_ref[...] = jnp.maximum(y2 + x, 0.0)                            # identity residual + ReLU


def _banded_weights(w_oihw, width):
    """OIHW (Cout, Cin, 3, 3) -> (3, W*Cin, W*Cout) banded block matrices.

    B[kh][(w + kw - 1)*Cin + ci, w*Cout + co] = w[co, ci, kh, kw] (zero outside the
    image), so horizontal taps + channel contraction + horizontal zero-padding are
    all folded into a single lane-dense matmul operand per vertical tap.
    """
    cout, cin, _, _ = w_oihw.shape
    wt = jnp.transpose(w_oihw, (2, 3, 1, 0)).astype(jnp.float32)     # (kh, kw, ci, co)
    bands = []
    for kh in range(3):
        b = jnp.zeros((width * cin, width * cout), jnp.float32)
        for kw in range(3):
            b = b + jnp.kron(jnp.eye(width, k=1 - kw, dtype=jnp.float32), wt[kh, kw])
        bands.append(b)
    return jnp.stack(bands)


def residual_block(x_nchw, w1, g1, b1, w2, g2, b2):
    """x_nchw: (N, C, H, W); w*: (C, C, 3, 3) PyTorch OIHW; g*/b*: (C,) BN gamma/beta."""
    N, C, H, W = x_nchw.shape
    assert w1.shape == (C, C, 3, 3) and w2.shape == (C, C, 3, 3), (
        "identity-shortcut ResidualBlock requires inchannel == outchannel and stride=1")
    NH, WC = N * H, W * C

    # Rough VMEM budget for the grid-less fused kernel (see TODO at top for big shapes).
    approx_bytes = 4 * (6 * NH * WC + 2 * NH * NH + WC * WC) + 2 * 6 * WC * WC
    assert approx_bytes < 24 * 1024 * 1024, (
        "shape too large for the fully-resident fused kernel; use a tiled variant")

    # ---- layout glue (outside the kernel): NCHW -> lane-dense (N*H, W*C) ----------
    x2d = jnp.transpose(x_nchw, (0, 2, 3, 1)).reshape(NH, WC).astype(jnp.float32)

    w1b = _banded_weights(w1, W).astype(jnp.bfloat16)                # (3, WC, WC)
    w2b = _banded_weights(w2, W).astype(jnp.bfloat16)

    eye_c = jnp.eye(C, dtype=jnp.float32)
    p = jnp.kron(jnp.ones((W, 1), jnp.float32), eye_c)               # (WC, C)
    q = p @ p.T                                                      # (WC, WC) pooling
    s_up = jnp.kron(jnp.eye(N, dtype=jnp.float32),
                    jnp.eye(H, k=-1, dtype=jnp.float32))             # (NH, NH)
    s_dn = jnp.kron(jnp.eye(N, dtype=jnp.float32),
                    jnp.eye(H, k=1, dtype=jnp.float32))

    def tile_param(v):                                               # (C,) -> (1, W*C)
        return jnp.tile(v.reshape(1, C).astype(jnp.float32), (1, W))

    kernel = functools.partial(_residual_block_kernel, nhw=float(N * H * W))
    out2d = pl.pallas_call(
        kernel,
        out_shape=jax.ShapeDtypeStruct((NH, WC), jnp.float32),
        in_specs=[pl.BlockSpec(memory_space=pltpu.MemorySpace.VMEM)] * 10,
        out_specs=pl.BlockSpec(memory_space=pltpu.MemorySpace.VMEM),
    )(x2d, s_up, s_dn, w1b, w2b, q,
      tile_param(g1), tile_param(b1), tile_param(g2), tile_param(b2))

    return jnp.transpose(out2d.reshape(N, H, W, C), (0, 3, 1, 2))    # back to NCHW


def _reference(x, w1, g1, b1, w2, g2, b2):
    """Pure-JAX reference (NCHW), training-mode BatchNorm."""
    def conv(y, w):
        return jax.lax.conv_general_dilated(
            y, w, window_strides=(1, 1), padding=((1, 1), (1, 1)),
            dimension_numbers=("NCHW", "OIHW", "NCHW"))

    def bn(y, g, b):
        mu = jnp.mean(y, axis=(0, 2, 3), keepdims=True)
        var = jnp.mean((y - mu) ** 2, axis=(0, 2, 3), keepdims=True)
        return ((y - mu) * jax.lax.rsqrt(var + EPS)
                * g.reshape(1, -1, 1, 1) + b.reshape(1, -1, 1, 1))

    y = jax.nn.relu(bn(conv(x, w1), g1, b1))
    y = bn(conv(y, w2), g2, b2)
    return jax.nn.relu(y + x)


if __name__ == "__main__":
    N, C, H, W = 2, 8, 16, 16          # W*C = 128 -> exactly one lane-dense row per image row
    key = jax.random.PRNGKey(0)
    kx, kw1, kw2, kg1, kb1, kg2, kb2 = jax.random.split(key, 7)

    x = jax.random.normal(kx, (N, C, H, W), jnp.float32)
    w1 = 0.1 * jax.random.normal(kw1, (C, C, 3, 3), jnp.float32)     # Conv2d.weight (OIHW)
    w2 = 0.1 * jax.random.normal(kw2, (C, C, 3, 3), jnp.float32)
    g1 = 1.0 + 0.1 * jax.random.normal(kg1, (C,), jnp.float32)       # BN gamma
    b1 = 0.1 * jax.random.normal(kb1, (C,), jnp.float32)             # BN beta
    g2 = 1.0 + 0.1 * jax.random.normal(kg2, (C,), jnp.float32)
    b2 = 0.1 * jax.random.normal(kb2, (C,), jnp.float32)

    out = residual_block(x, w1, g1, b1, w2, g2, b2)
    out = jax.block_until_ready(out)
    ref = _reference(x, w1, g1, b1, w2, g2, b2)

    assert out.shape == (N, C, H, W)
    # Conv matmuls use bf16 operands (f32 accumulation), so tolerance is looser than pure f32.
    assert jnp.max(jnp.abs(out - ref)) < 5e-2, "mismatch vs pure-JAX reference"
    print("KERNEL_OK")
</pallas_src>

<mosaic_0001>
module attributes {stable_mosaic.version = 11 : i64} {
  func.func @_residual_block_kernel(%arg0: memref<32x128xf32, #tpu.memory_space<vmem>>, %arg1: memref<32x32xf32, #tpu.memory_space<vmem>>, %arg2: memref<32x32xf32, #tpu.memory_space<vmem>>, %arg3: memref<3x128x128xbf16, #tpu.memory_space<vmem>>, %arg4: memref<3x128x128xbf16, #tpu.memory_space<vmem>>, %arg5: memref<128x128xf32, #tpu.memory_space<vmem>>, %arg6: memref<1x128xf32, #tpu.memory_space<vmem>>, %arg7: memref<1x128xf32, #tpu.memory_space<vmem>>, %arg8: memref<1x128xf32, #tpu.memory_space<vmem>>, %arg9: memref<1x128xf32, #tpu.memory_space<vmem>>, %arg10: memref<32x128xf32, #tpu.memory_space<vmem>>) attributes {dimension_semantics = [], scalar_prefetch = 0 : i64, scratch_operands = 0 : i64, tpu.core_type = #tpu.core_type<tc>} {
    %c0 = arith.constant 0 : index
    %c0_0 = arith.constant 0 : index
    %0 = vector.load %arg0[%c0, %c0_0] : memref<32x128xf32, #tpu.memory_space<vmem>>, vector<32x128xf32>
    %c0_1 = arith.constant 0 : index
    %c0_2 = arith.constant 0 : index
    %1 = vector.load %arg1[%c0_1, %c0_2] : memref<32x32xf32, #tpu.memory_space<vmem>>, vector<32x32xf32>
    %c0_3 = arith.constant 0 : index
    %c0_4 = arith.constant 0 : index
    %2 = vector.load %arg2[%c0_3, %c0_4] : memref<32x32xf32, #tpu.memory_space<vmem>>, vector<32x32xf32>
    %c0_5 = arith.constant 0 : index
    %c0_6 = arith.constant 0 : index
    %3 = vector.load %arg5[%c0_5, %c0_6] : memref<128x128xf32, #tpu.memory_space<vmem>>, vector<128x128xf32>
    %cst = arith.constant dense<0.000000e+00> : vector<32x128xf32>
    %4 = tpu.matmul %1, %0, %cst {dimension_numbers = #tpu.dot_dimension_numbers<[1], [0], [0], [1], [0, 0, 1, 1], [], []>} : vector<32x32xf32>, vector<32x128xf32>, vector<32x128xf32> -> vector<32x128xf32>
    %cst_7 = arith.constant dense<0.000000e+00> : vector<32x128xf32>
    %5 = tpu.matmul %2, %0, %cst_7 {dimension_numbers = #tpu.dot_dimension_numbers<[1], [0], [0], [1], [0, 0, 1, 1], [], []>} : vector<32x32xf32>, vector<32x128xf32>, vector<32x128xf32> -> vector<32x128xf32>
    %6 = arith.truncf %4 : vector<32x128xf32> to vector<32x128xbf16>
    %c0_8 = arith.constant 0 : index
    %c0_9 = arith.constant 0 : index
    %c0_10 = arith.constant 0 : index
    %7 = vector.load %arg3[%c0_8, %c0_9, %c0_10] : memref<3x128x128xbf16, #tpu.memory_space<vmem>>, vector<1x128x128xbf16>
    %8 = vector.shape_cast %7 : vector<1x128x128xbf16> to vector<128x128xbf16>
    %cst_11 = arith.constant dense<0.000000e+00> : vector<32x128xf32>
    %9 = tpu.matmul %6, %8, %cst_11 {dimension_numbers = #tpu.dot_dimension_numbers<[1], [0], [0], [1], [0, 0, 1, 1], [], []>} : vector<32x128xbf16>, vector<128x128xbf16>, vector<32x128xf32> -> vector<32x128xf32>
    %10 = arith.truncf %0 : vector<32x128xf32> to vector<32x128xbf16>
    %c1 = arith.constant 1 : index
    %c0_12 = arith.constant 0 : index
    %c0_13 = arith.constant 0 : index
    %11 = vector.load %arg3[%c1, %c0_12, %c0_13] : memref<3x128x128xbf16, #tpu.memory_space<vmem>>, vector<1x128x128xbf16>
    %12 = vector.shape_cast %11 : vector<1x128x128xbf16> to vector<128x128xbf16>
    %cst_14 = arith.constant dense<0.000000e+00> : vector<32x128xf32>
    %13 = tpu.matmul %10, %12, %cst_14 {dimension_numbers = #tpu.dot_dimension_numbers<[1], [0], [0], [1], [0, 0, 1, 1], [], []>} : vector<32x128xbf16>, vector<128x128xbf16>, vector<32x128xf32> -> vector<32x128xf32>
    %14 = arith.addf %9, %13 : vector<32x128xf32>
    %15 = arith.truncf %5 : vector<32x128xf32> to vector<32x128xbf16>
    %c2 = arith.constant 2 : index
    %c0_15 = arith.constant 0 : index
    %c0_16 = arith.constant 0 : index
    %16 = vector.load %arg3[%c2, %c0_15, %c0_16] : memref<3x128x128xbf16, #tpu.memory_space<vmem>>, vector<1x128x128xbf16>
    %17 = vector.shape_cast %16 : vector<1x128x128xbf16> to vector<128x128xbf16>
    %cst_17 = arith.constant dense<0.000000e+00> : vector<32x128xf32>
    %18 = tpu.matmul %15, %17, %cst_17 {dimension_numbers = #tpu.dot_dimension_numbers<[1], [0], [0], [1], [0, 0, 1, 1], [], []>} : vector<32x128xbf16>, vector<128x128xbf16>, vector<32x128xf32> -> vector<32x128xf32>
    %19 = arith.addf %14, %18 : vector<32x128xf32>
    %cst_18 = arith.constant dense<0.000000e+00> : vector<32x128xf32>
    %20 = tpu.matmul %19, %3, %cst_18 {dimension_numbers = #tpu.dot_dimension_numbers<[1], [0], [0], [1], [0, 0, 1, 1], [], []>} : vector<32x128xf32>, vector<128x128xf32>, vector<32x128xf32> -> vector<32x128xf32>
    %cst_19 = arith.constant dense<0.000000e+00> : vector<128xf32>
    %21 = vector.multi_reduction <add>, %20, %cst_19 [0] : vector<32x128xf32> to vector<128xf32>
    %22 = vector.shape_cast %21 : vector<128xf32> to vector<1x128xf32>
    %23 = arith.mulf %19, %19 : vector<32x128xf32>
    %cst_20 = arith.constant dense<0.000000e+00> : vector<32x128xf32>
    %24 = tpu.matmul %23, %3, %cst_20 {dimension_numbers = #tpu.dot_dimension_numbers<[1], [0], [0], [1], [0, 0, 1, 1], [], []>} : vector<32x128xf32>, vector<128x128xf32>, vector<32x128xf32> -> vector<32x128xf32>
    %cst_21 = arith.constant dense<0.000000e+00> : vector<128xf32>
    %25 = vector.multi_reduction <add>, %24, %cst_21 [0] : vector<32x128xf32> to vector<128xf32>
    %26 = vector.shape_cast %25 : vector<128xf32> to vector<1x128xf32>
    %cst_22 = arith.constant 0.001953125 : f32
    %27 = vector.broadcast %cst_22 : f32 to vector<1x128xf32>
    %28 = arith.mulf %22, %27 : vector<1x128xf32>
    %cst_23 = arith.constant 0.001953125 : f32
    %29 = vector.broadcast %cst_23 : f32 to vector<1x128xf32>
    %30 = arith.mulf %26, %29 : vector<1x128xf32>
    %31 = arith.mulf %28, %28 : vector<1x128xf32>
    %32 = arith.subf %30, %31 : vector<1x128xf32>
    %c0_24 = arith.constant 0 : index
    %c0_25 = arith.constant 0 : index
    %33 = vector.load %arg6[%c0_24, %c0_25] : memref<1x128xf32, #tpu.memory_space<vmem>>, vector<1x128xf32>
    %cst_26 = arith.constant 9.99999974E-6 : f32
    %34 = vector.broadcast %cst_26 : f32 to vector<1x128xf32>
    %35 = arith.addf %32, %34 : vector<1x128xf32>
    %36 = math.rsqrt %35 : vector<1x128xf32>
    %37 = arith.mulf %33, %36 : vector<1x128xf32>
    %c0_27 = arith.constant 0 : index
    %c0_28 = arith.constant 0 : index
    %38 = vector.load %arg7[%c0_27, %c0_28] : memref<1x128xf32, #tpu.memory_space<vmem>>, vector<1x128xf32>
    %39 = arith.mulf %28, %37 : vector<1x128xf32>
    %40 = arith.subf %38, %39 : vector<1x128xf32>
    %41 = vector.broadcast %37 : vector<1x128xf32> to vector<32x128xf32>
    %42 = arith.mulf %19, %41 : vector<32x128xf32>
    %43 = vector.broadcast %40 : vector<1x128xf32> to vector<32x128xf32>
    %44 = arith.addf %42, %43 : vector<32x128xf32>
    %cst_29 = arith.constant 0.000000e+00 : f32
    %45 = vector.broadcast %cst_29 : f32 to vector<32x128xf32>
    %46 = arith.maximumf %44, %45 : vector<32x128xf32>
    %cst_30 = arith.constant dense<0.000000e+00> : vector<32x128xf32>
    %47 = tpu.matmul %1, %46, %cst_30 {dimension_numbers = #tpu.dot_dimension_numbers<[1], [0], [0], [1], [0, 0, 1, 1], [], []>} : vector<32x32xf32>, vector<32x128xf32>, vector<32x128xf32> -> vector<32x128xf32>
    %cst_31 = arith.constant dense<0.000000e+00> : vector<32x128xf32>
    %48 = tpu.matmul %2, %46, %cst_31 {dimension_numbers = #tpu.dot_dimension_numbers<[1], [0], [0], [1], [0, 0, 1, 1], [], []>} : vector<32x32xf32>, vector<32x128xf32>, vector<32x128xf32> -> vector<32x128xf32>
    %49 = arith.truncf %47 : vector<32x128xf32> to vector<32x128xbf16>
    %c0_32 = arith.constant 0 : index
    %c0_33 = arith.constant 0 : index
    %c0_34 = arith.constant 0 : index
    %50 = vector.load %arg4[%c0_32, %c0_33, %c0_34] : memref<3x128x128xbf16, #tpu.memory_space<vmem>>, vector<1x128x128xbf16>
    %51 = vector.shape_cast %50 : vector<1x128x128xbf16> to vector<128x128xbf16>
    %cst_35 = arith.constant dense<0.000000e+00> : vector<32x128xf32>
    %52 = tpu.matmul %49, %51, %cst_35 {dimension_numbers = #tpu.dot_dimension_numbers<[1], [0], [0], [1], [0, 0, 1, 1], [], []>} : vector<32x128xbf16>, vector<128x128xbf16>, vector<32x128xf32> -> vector<32x128xf32>
    %53 = arith.truncf %46 : vector<32x128xf32> to vector<32x128xbf16>
    %c1_36 = arith.constant 1 : index
    %c0_37 = arith.constant 0 : index
    %c0_38 = arith.constant 0 : index
    %54 = vector.load %arg4[%c1_36, %c0_37, %c0_38] : memref<3x128x128xbf16, #tpu.memory_space<vmem>>, vector<1x128x128xbf16>
    %55 = vector.shape_cast %54 : vector<1x128x128xbf16> to vector<128x128xbf16>
    %cst_39 = arith.constant dense<0.000000e+00> : vector<32x128xf32>
    %56 = tpu.matmul %53, %55, %cst_39 {dimension_numbers = #tpu.dot_dimension_numbers<[1], [0], [0], [1], [0, 0, 1, 1], [], []>} : vector<32x128xbf16>, vector<128x128xbf16>, vector<32x128xf32> -> vector<32x128xf32>
    %57 = arith.addf %52, %56 : vector<32x128xf32>
    %58 = arith.truncf %48 : vector<32x128xf32> to vector<32x128xbf16>
    %c2_40 = arith.constant 2 : index
    %c0_41 = arith.constant 0 : index
    %c0_42 = arith.constant 0 : index
    %59 = vector.load %arg4[%c2_40, %c0_41, %c0_42] : memref<3x128x128xbf16, #tpu.memory_space<vmem>>, vector<1x128x128xbf16>
    %60 = vector.shape_cast %59 : vector<1x128x128xbf16> to vector<128x128xbf16>
    %cst_43 = arith.constant dense<0.000000e+00> : vector<32x128xf32>
    %61 = tpu.matmul %58, %60, %cst_43 {dimension_numbers = #tpu.dot_dimension_numbers<[1], [0], [0], [1], [0, 0, 1, 1], [], []>} : vector<32x128xbf16>, vector<128x128xbf16>, vector<32x128xf32> -> vector<32x128xf32>
    %62 = arith.addf %57, %61 : vector<32x128xf32>
    %cst_44 = arith.constant dense<0.000000e+00> : vector<32x128xf32>
    %63 = tpu.matmul %62, %3, %cst_44 {dimension_numbers = #tpu.dot_dimension_numbers<[1], [0], [0], [1], [0, 0, 1, 1], [], []>} : vector<32x128xf32>, vector<128x128xf32>, vector<32x128xf32> -> vector<32x128xf32>
    %cst_45 = arith.constant dense<0.000000e+00> : vector<128xf32>
    %64 = vector.multi_reduction <add>, %63, %cst_45 [0] : vector<32x128xf32> to vector<128xf32>
    %65 = vector.shape_cast %64 : vector<128xf32> to vector<1x128xf32>
    %66 = arith.mulf %62, %62 : vector<32x128xf32>
    %cst_46 = arith.constant dense<0.000000e+00> : vector<32x128xf32>
    %67 = tpu.matmul %66, %3, %cst_46 {dimension_numbers = #tpu.dot_dimension_numbers<[1], [0], [0], [1], [0, 0, 1, 1], [], []>} : vector<32x128xf32>, vector<128x128xf32>, vector<32x128xf32> -> vector<32x128xf32>
    %cst_47 = arith.constant dense<0.000000e+00> : vector<128xf32>
    %68 = vector.multi_reduction <add>, %67, %cst_47 [0] : vector<32x128xf32> to vector<128xf32>
    %69 = vector.shape_cast %68 : vector<128xf32> to vector<1x128xf32>
    %cst_48 = arith.constant 0.001953125 : f32
    %70 = vector.broadcast %cst_48 : f32 to vector<1x128xf32>
    %71 = arith.mulf %65, %70 : vector<1x128xf32>
    %cst_49 = arith.constant 0.001953125 : f32
    %72 = vector.broadcast %cst_49 : f32 to vector<1x128xf32>
    %73 = arith.mulf %69, %72 : vector<1x128xf32>
    %74 = arith.mulf %71, %71 : vector<1x128xf32>
    %75 = arith.subf %73, %74 : vector<1x128xf32>
    %c0_50 = arith.constant 0 : index
    %c0_51 = arith.constant 0 : index
    %76 = vector.load %arg8[%c0_50, %c0_51] : memref<1x128xf32, #tpu.memory_space<vmem>>, vector<1x128xf32>
    %cst_52 = arith.constant 9.99999974E-6 : f32
    %77 = vector.broadcast %cst_52 : f32 to vector<1x128xf32>
    %78 = arith.addf %75, %77 : vector<1x128xf32>
    %79 = math.rsqrt %78 : vector<1x128xf32>
    %80 = arith.mulf %76, %79 : vector<1x128xf32>
    %c0_53 = arith.constant 0 : index
    %c0_54 = arith.constant 0 : index
    %81 = vector.load %arg9[%c0_53, %c0_54] : memref<1x128xf32, #tpu.memory_space<vmem>>, vector<1x128xf32>
    %82 = arith.mulf %71, %80 : vector<1x128xf32>
    %83 = arith.subf %81, %82 : vector<1x128xf32>
    %84 = vector.broadcast %80 : vector<1x128xf32> to vector<32x128xf32>
    %85 = arith.mulf %62, %84 : vector<32x128xf32>
    %86 = vector.broadcast %83 : vector<1x128xf32> to vector<32x128xf32>
    %87 = arith.addf %85, %86 : vector<32x128xf32>
    %88 = arith.addf %87, %0 : vector<32x128xf32>
    %cst_55 = arith.constant 0.000000e+00 : f32
    %89 = vector.broadcast %cst_55 : f32 to vector<32x128xf32>
    %90 = arith.maximumf %88, %89 : vector<32x128xf32>
    %c0_56 = arith.constant 0 : index
    %c0_57 = arith.constant 0 : index
    %91 = vector.load %arg10[%c0_56, %c0_57] : memref<32x128xf32, #tpu.memory_space<vmem>>, vector<32x128xf32>
    tpu.vector_store %arg10[%c0_56, %c0_57], %90 {strides = array<i32>} : memref<32x128xf32, #tpu.memory_space<vmem>>, vector<32x128xf32>,
    return
  }
}

</mosaic_0001>

<bundles_post_ra>
// kernel: tpu_custom_call.1
= control target key start
LH: loop header
LB: loop body
LE: loop exit
PB: predicated region body
PF: predicated region fallthrough
CT: control target
= control target key end

     0   :  { %15 = vsyncpa [#allocation3], 0  ;;  %s3053_s0 = inlined_call_operand.hbm [shape: f32[32,128], index: 0, kind: input, shape index: {}]   ;;  %s3054_s1 = inlined_call_operand.hbm [shape: f32[32,32], index: 1, kind: input, shape index: {}]   ;;  %s3055_s2 = inlined_call_operand.hbm [shape: f32[32,32], index: 2, kind: input, shape index: {}]   ;;  %s3056_s3 = inlined_call_operand.hbm [shape: bf16[3,128,128], index: 3, kind: input, shape index: {}]   ;;  %s3057_s4 = inlined_call_operand.hbm [shape: bf16[3,128,128], index: 4, kind: input, shape index: {}]   ;;  %s3058_s5 = inlined_call_operand.hbm [shape: f32[128,128], index: 5, kind: input, shape index: {}]   ;;  %s3059_s6 = inlined_call_operand.vmem [shape: f32[1,128], index: 6, kind: input, shape index: {}]   ;;  %s3060_s7 = inlined_call_operand.vmem [shape: f32[1,128], index: 7, kind: input, shape index: {}]   ;;  %s3061_s8 = inlined_call_operand.vmem [shape: f32[1,128], index: 8, kind: input, shape index: {}]   ;;  %s3062_s9 = inlined_call_operand.vmem [shape: f32[1,128], index: 9, kind: input, shape index: {}]   ;;  %s3063_s10 = inlined_call_operand.hbm [shape: f32[32,128], index: 10, kind: output, shape index: {}]  }
   0x1   :  { %16 = vsyncpa [#allocation6], 0 }
   0x2   :  { %17 = vsyncpa [#allocation9], 0 }
   0x3   :  { %18 = vsyncpa [#allocation12], 0 }
   0x4   :  { %19 = vsyncpa [#allocation4], 0  ;;  %s2667_s13 = smov [#allocation5]   ;;  %s2668_s15 = smov [#allocation8]  }
   0x5   :  { %s37_s14 = sshll.u32 %s2667_s13, 4  ;;  %s61_s16 = sshll.u32 %s2668_s15, 4  ;;  %s38_s14 = int_to_ptr.vmem [resolvable:$true] %s37_s14  ;;  %s2733_s16 = int_to_ptr.vmem [resolvable:$true] %s61_s16 }
   0x6   :  { %s2503_s19 = scalar_lea.hbm %s3054_s1, 512 }
   0x7   :  { %p2504_p0 = scmp.ne.s32.totalorder %s3054_s1, %s2503_s19  ;;  %p2507_p1 = scmp.lt.u32.totalorder %s2503_s19, %s3054_s1 }
   0x9   :  { %p2509_p2 = pnand %p2507_p1, %p2504_p0 }
   0xb   :  { %2512 = shalt.err (!%p2509_p2)
}
   0xc   :  { %s2513_s24 = scalar_lea.vmem %s38_s14, 512  ;;  %p2518_p4 = scmp.lt.s32.totalorder %s38_s14, %s38_s14 }
   0xd   :  { %p2514_p3 = scmp.ne.s32.totalorder %s38_s14, %s2513_s24  ;;  %p2519_p5 = scmp.lt.s32.totalorder %s2513_s24, %s2513_s24 }
   0xf   :  { %p2520_p6 = por %p2519_p5, %p2518_p4 }
  0x11   :  { %p2521_p7 = pnand %p2520_p6, %p2514_p3 }
  0x13   :  { %2524 = shalt.err (!%p2521_p7)
}
  0x14   :  { %s2669_s25 = smov 128   ;;  %s2670_s26 = smov 8  }
  0x15   :  { %43 = dma.hbm_to_vmem [thread:$0]  %s3054_s1, 512, %s38_s14, [#allocation6], %s2669_s25, %s2669_s25, %s2670_s26  }
  0x16   :  { %s2525_s11 = scalar_lea.hbm %s3056_s3, 3072 }
  0x17   :  { %p2526_p8 = scmp.ne.s32.totalorder %s3056_s3, %s2525_s11  ;;  %p2529_p9 = scmp.lt.u32.totalorder %s2525_s11, %s3056_s3 }
  0x19   :  { %p2531_p10 = pnand %p2529_p9, %p2526_p8 }
  0x1b   :  { %2534 = shalt.err (!%p2531_p10)
}
  0x1c   :  { %s2535_s18 = scalar_lea.vmem %s2733_s16, 3072  ;;  %p2540_p12 = scmp.lt.s32.totalorder %s2733_s16, %s2733_s16 }
  0x1d   :  { %p2536_p11 = scmp.ne.s32.totalorder %s2733_s16, %s2535_s18  ;;  %p2541_p13 = scmp.lt.s32.totalorder %s2535_s18, %s2535_s18 }
  0x1f   :  { %p2542_p0 = por %p2541_p13, %p2540_p12 }
  0x21   :  { %p2543_p1 = pnand %p2542_p0, %p2536_p11 }
  0x23   :  { %2546 = shalt.err (!%p2543_p1)
}
  0x24   :  { %s2671_s1 = smov 64   ;;  %s2672_s14 = smov 4  }
  0x25   :  { %67 = dma.hbm_to_vmem [thread:$0]  %s3056_s3, 3072, %s2733_s16, [#allocation9], %s2671_s1, %s2671_s1, %s2672_s14  }
  0x26   :  { %s2673_s21 = smov [#allocation2]   ;;  %s2674_s23 = smov [#allocation7]  }
  0x27   :  { %s25_s22 = sshll.u32 %s2673_s21, 4  ;;  %s49_s24 = sshll.u32 %s2674_s23, 4  ;;  %s26_s22 = int_to_ptr.vmem [resolvable:$true] %s25_s22  ;;  %s2770_s24 = int_to_ptr.vmem [resolvable:$true] %s49_s24 }
  0x28   :  { %s2547_s29 = scalar_lea.hbm %s3053_s0, 512 }
  0x29   :  { %p2548_p2 = scmp.ne.s32.totalorder %s3053_s0, %s2547_s29  ;;  %p2551_p3 = scmp.lt.u32.totalorder %s2547_s29, %s3053_s0 }
  0x2b   :  { %p2553_p4 = pnand %p2551_p3, %p2548_p2 }
  0x2d   :  { %2556 = shalt.err (!%p2553_p4)
}
  0x2e   :  { %s2557_s3 = scalar_lea.vmem %s26_s22, 512  ;;  %p2562_p6 = scmp.lt.s32.totalorder %s26_s22, %s26_s22 }
  0x2f   :  { %p2558_p5 = scmp.ne.s32.totalorder %s26_s22, %s2557_s3  ;;  %p2563_p7 = scmp.lt.s32.totalorder %s2557_s3, %s2557_s3 }
  0x31   :  { %p2564_p8 = por %p2563_p7, %p2562_p6 }
  0x33   :  { %p2565_p9 = pnand %p2564_p8, %p2558_p5 }
  0x35   :  { %2568 = shalt.err (!%p2565_p9)
}
  0x36   :  { %31 = dma.hbm_to_vmem [thread:$0]  %s3053_s0, 512, %s26_s22, [#allocation3], %s2669_s25, %s2669_s25, %s2670_s26  }
  0x37   :  { %s2569_s19 = scalar_lea.hbm %s3055_s2, 512 }
  0x38   :  { %p2570_p10 = scmp.ne.s32.totalorder %s3055_s2, %s2569_s19  ;;  %p2573_p11 = scmp.lt.u32.totalorder %s2569_s19, %s3055_s2 }
  0x3a   :  { %p2575_p12 = pnand %p2573_p11, %p2570_p10 }
  0x3c   :  { %2578 = shalt.err (!%p2575_p12)
}
  0x3d   :  { %s2579_s28 = scalar_lea.vmem %s2770_s24, 512  ;;  %p2584_p0 = scmp.lt.s32.totalorder %s2770_s24, %s2770_s24 }
  0x3e   :  { %p2580_p13 = scmp.ne.s32.totalorder %s2770_s24, %s2579_s28  ;;  %p2585_p1 = scmp.lt.s32.totalorder %s2579_s28, %s2579_s28 }
  0x40   :  { %p2586_p2 = por %p2585_p1, %p2584_p0 }
  0x42   :  { %p2587_p3 = pnand %p2586_p2, %p2580_p13 }
  0x44   :  { %2590 = shalt.err (!%p2587_p3)
}
  0x45   :  { %55 = dma.hbm_to_vmem [thread:$0]  %s3055_s2, 512, %s2770_s24, [#allocation6], %s2669_s25, %s2669_s25, %s2670_s26  }
  0x46   :  { %s2675_s29 = smov [#allocation10]   ;;  %s2676_s11 = smov [#allocation11]  }
  0x47   :  { %s73_s30 = sshll.u32 %s2675_s29, 4  ;;  %s85_s12 = sshll.u32 %s2676_s11, 4  ;;  %s74_s30 = int_to_ptr.vmem [resolvable:$true] %s73_s30  ;;  %s2807_s12 = int_to_ptr.vmem [resolvable:$true] %s85_s12 }
  0x48   :  { %s2591_s16 = scalar_lea.hbm %s3057_s4, 3072 }
  0x49   :  { %p2592_p4 = scmp.ne.s32.totalorder %s3057_s4, %s2591_s16  ;;  %p2595_p5 = scmp.lt.u32.totalorder %s2591_s16, %s3057_s4 }
  0x4b   :  { %p2597_p6 = pnand %p2595_p5, %p2592_p4 }
  0x4d   :  { %2600 = shalt.err (!%p2597_p6)
}
  0x4e   :  { %s2601_s2 = scalar_lea.vmem %s74_s30, 3072  ;;  %p2606_p8 = scmp.lt.s32.totalorder %s74_s30, %s74_s30 }
  0x4f   :  { %p2602_p7 = scmp.ne.s32.totalorder %s74_s30, %s2601_s2  ;;  %p2607_p9 = scmp.lt.s32.totalorder %s2601_s2, %s2601_s2 }
  0x51   :  { %p2608_p10 = por %p2607_p9, %p2606_p8 }
  0x53   :  { %p2609_p11 = pnand %p2608_p10, %p2602_p7 }
  0x55   :  { %2612 = shalt.err (!%p2609_p11)
}
  0x56   :  { %79 = dma.hbm_to_vmem [thread:$0]  %s3057_s4, 3072, %s74_s30, [#allocation9], %s2671_s1, %s2671_s1, %s2672_s14  }
  0x57   :  { %s2613_s27 = scalar_lea.hbm %s3058_s5, 2048 }
  0x58   :  { %p2614_p12 = scmp.ne.s32.totalorder %s3058_s5, %s2613_s27  ;;  %p2617_p13 = scmp.lt.u32.totalorder %s2613_s27, %s3058_s5 }
  0x5a   :  { %p2619_p0 = pnand %p2617_p13, %p2614_p12 }
  0x5c   :  { %2622 = shalt.err (!%p2619_p0)
}
  0x5d   :  { %s2623_s11 = scalar_lea.vmem %s2807_s12, 2048  ;;  %p2628_p2 = scmp.lt.s32.totalorder %s2807_s12, %s2807_s12 }
  0x5e   :  { %p2624_p1 = scmp.ne.s32.totalorder %s2807_s12, %s2623_s11  ;;  %p2629_p3 = scmp.lt.s32.totalorder %s2623_s11, %s2623_s11 }
  0x60   :  { %p2630_p4 = por %p2629_p3, %p2628_p2 }
  0x62   :  { %p2631_p5 = pnand %p2630_p4, %p2624_p1 }
  0x64   :  { %2634 = shalt.err (!%p2631_p5)
}
  0x65   :  { %91 = dma.hbm_to_vmem [thread:$0]  %s3058_s5, 2048, %s2807_s12, [#allocation12], %s2669_s25, %s2669_s25, %s2670_s26  }
  0x66   :  { %2657 = dma.done.wait [#allocation3], 512  }
  0x67   :  { %2658 = vsyncadd [#allocation3], 4294966784 }
  0x68   :  { %2659 = dma.done.wait [#allocation6], 1024  }
  0x69   :  { %2660 = vsyncadd [#allocation6], 4294966272 }
  0x6a   :  { %2661 = dma.done.wait [#allocation9], 6144  }
  0x6b   :  { %2662 = vsyncadd [#allocation9], 4294961152 }
  0x6c   :  { %2663 = dma.done.wait [#allocation12], 2048  }
  0x6d   :  { %2664 = vsyncadd [#allocation12], 4294965248  ;;  %vm147_vm0 = vcmask 261120   ;;  %v119_v0 = vld [vmem:[#allocation2] sm:$0xff]  ;;  %v120_v1 = vld [vmem:[#allocation2 + $0x8] sm:$0xff] }
  0x6e   :  { %v121_v2 = vld [vmem:[#allocation2 + $0x10] sm:$0xff]  ;;  %v2260_v3 = vpack.c.bf16 %v120_v1, %v119_v0  ;;  %v122_v4 = vld [vmem:[#allocation2 + $0x18] sm:$0xff]  ;;  %v2844_v5 = vld [vmem:[#allocation5] sm:$0xff] }
  0x6f   :  { %v2264_v6 = vpack.c.bf16 %v122_v4, %v121_v2  ;;  %1940 = vmatprep.mubr.msk.f32.mxu0 %vm147_vm0, %v2844_v5  ;;  %v2848_v7 = vld [vmem:[#allocation5 + $0x8] sm:$0xff]  ;;  %v2850_v8 = vld [vmem:[#allocation5 + $0x10] sm:$0xff]  ;;  %v2854_v9 = vld [vmem:[#allocation5 + $0x18] sm:$0xff] }
  0x70   :  { %2261 = vmatprep.subr.bf16.mxu0 %v2260_v3  ;;  %v2858_v10 = vld [vmem:[#allocation7] sm:$0xff]  ;;  %v2862_v12 = vld [vmem:[#allocation7 + $0x8] sm:$0xff]  ;;  %v2866_v13 = vld [vmem:[#allocation7 + $0x10] sm:$0xff] }
  0x71   :  { %2263 = vmatpush3.bf16.msra.mxu0 %v2260_v3  ;;  %v2447_v11 = vld [vmem:[#allocation8 + $0x40] sm:$0xff]   ;;  %v2448_v14 = vld [vmem:[#allocation8 + $0x48] sm:$0xff]   ;;  %v2868_v15 = vld [vmem:[#allocation7 + $0x18] sm:$0xff] }
  0x72   :  { %2265 = vmatprep.subr.bf16.mxu0 %v2264_v6  ;;  %v2449_v16 = vld [vmem:[#allocation8 + $0x50] sm:$0xff]   ;;  %v2450_v17 = vld [vmem:[#allocation8 + $0x58] sm:$0xff]   ;;  %v2451_v18 = vld [vmem:[#allocation8 + $0x60] sm:$0xff]  }
  0x73   :  { %v2452_v19 = vld [vmem:[#allocation8 + $0x68] sm:$0xff]   ;;  %v2453_v20 = vld [vmem:[#allocation8 + $0x70] sm:$0xff]   ;;  %v2454_v21 = vld [vmem:[#allocation8 + $0x78] sm:$0xff]  }
  0x74   :  { %v2455_v22 = vld [vmem:[#allocation8] sm:$0xff]   ;;  %v2456_v23 = vld [vmem:[#allocation8 + $0x8] sm:$0xff]   ;;  %v2457_v24 = vld [vmem:[#allocation8 + $0x10] sm:$0xff]  }
  0x75   :  { %2267 = vmatpush3.bf16.msra.mxu0 %v2264_v6  ;;  %v2458_v25 = vld [vmem:[#allocation8 + $0x18] sm:$0xff]   ;;  %v2459_v26 = vld [vmem:[#allocation8 + $0x20] sm:$0xff]   ;;  %v2460_v27 = vld [vmem:[#allocation8 + $0x28] sm:$0xff]  }
  0x76   :  { %2269 = vmatprep.subr.bf16.mxu0 %v2260_v3  ;;  %v2461_v28 = vld [vmem:[#allocation8 + $0x30] sm:$0xff]   ;;  %v2462_v29 = vld [vmem:[#allocation8 + $0x38] sm:$0xff]   ;;  %v2463_v30 = vld [vmem:[#allocation8 + $0x80] sm:$0xff]  }
  0x77   :  { %v131_v31 = vld [vmem:[#allocation11] sm:$0xff]  ;;  %v132_v32 = vld [vmem:[#allocation11 + $0x8] sm:$0xff]  ;;  %v133_v33 = vld [vmem:[#allocation11 + $0x10] sm:$0xff] }
  0x78   :  { %1941 = vmatmul.mubr.msk.f32.vlgmr.msra.gmra.mrb[0].mxu0 %vm147_vm0, %v2848_v7  ;;  %v2876_v34 = vpack.c.bf16 %v132_v32, %v131_v31  ;;  %v134_v35 = vld [vmem:[#allocation11 + $0x18] sm:$0xff]  ;;  %v135_v37 = vld [vmem:[#allocation11 + $0x20] sm:$0xff]  ;;  %v136_v38 = vld [vmem:[#allocation11 + $0x28] sm:$0xff] }
  0x79   :  { %1943 = vmatprep.mubr.msk.f32.mxu0 %vm147_vm0, %v2850_v8  ;;  %2271 = vmatpush3.bf16.msra.mxu0 %v2260_v3  ;;  %v2878_v36 = vpack.c.bf16 %v134_v35, %v133_v33  ;;  %v2883_v39 = vpack.c.bf16 %v136_v38, %v135_v37  ;;  %v137_v40 = vld [vmem:[#allocation11 + $0x30] sm:$0xff]  ;;  %v138_v41 = vld [vmem:[#allocation11 + $0x38] sm:$0xff]  ;;  %v139_v43 = vld [vmem:[#allocation11 + $0x40] sm:$0xff] }
  0x7a   :  { %2273 = vmatprep.subr.bf16.mxu0 %v2264_v6  ;;  %2277 = vmatprep.subr.bf16.mxu1 %v2876_v34  ;;  %v2887_v42 = vpack.c.bf16 %v138_v41, %v137_v40  ;;  %v140_v44 = vld [vmem:[#allocation11 + $0x48] sm:$0xff]  ;;  %v141_v46 = vld [vmem:[#allocation11 + $0x50] sm:$0xff]  ;;  %v142_v47 = vld [vmem:[#allocation11 + $0x58] sm:$0xff] }
  0x7b   :  { %2279 = vmatpush3.bf16.msra.mxu1 %v2876_v34  ;;  %v2891_v45 = vpack.c.bf16 %v140_v44, %v139_v43  ;;  %v2895_v48 = vpack.c.bf16 %v142_v47, %v141_v46  ;;  %v143_v49 = vld [vmem:[#allocation11 + $0x60] sm:$0xff]  ;;  %v144_v50 = vld [vmem:[#allocation11 + $0x68] sm:$0xff]  ;;  %v145_v52 = vld [vmem:[#allocation11 + $0x70] sm:$0xff] }
  0x7c   :  { %1944 = vmatmul.mubr.msk.f32.gmra.mrb[2].mxu0 %vm147_vm0, %v2854_v9  ;;  %2281 = vmatprep.subr.bf16.mxu1 %v2878_v36  ;;  %v2899_v51 = vpack.c.bf16 %v144_v50, %v143_v49  ;;  %v146_v53 = vld [vmem:[#allocation11 + $0x78] sm:$0xff]  ;;  %v2464_v61 = vld [vmem:[#allocation8 + $0x88] sm:$0xff]   ;;  %v2465_v0 = vld [vmem:[#allocation8 + $0x90] sm:$0xff]  }
  0x7d   :  { %2275 = vmatpush3.bf16.msra.mxu0 %v2264_v6  ;;  %1954 = vmatprep.mubr.msk.f32.mxu0 %vm147_vm0, %v2858_v10  ;;  %v2903_v54 = vpack.c.bf16 %v146_v53, %v145_v52  ;;  %v2466_v4 = vld [vmem:[#allocation8 + $0x98] sm:$0xff]  }
  0x7e   :  { %1960 = vmatprep.subr.bf16.mxu0 %v2447_v11 }
  0x7f   :  { %2283 = vmatpush3.bf16.msra.mxu1 %v2878_v36 }
  0x80   :  { %1955 = vmatmul.mubr.msk.f32.vlgmr.msra.gmra.mrb[4].mxu0 %vm147_vm0, %v2862_v12  ;;  %2285 = vmatprep.subr.bf16.mxu1 %v2883_v39 }
  0x81   :  { %1957 = vmatprep.mubr.msk.f32.mxu0 %vm147_vm0, %v2866_v13  ;;  %1961 = vmatpush3.bf16.msra.mxu0 %v2447_v11  ;;  %v2467_v11 = vld [vmem:[#allocation8 + $0xa0] sm:$0xff]  }
  0x82   :  { %1962 = vmatprep.subr.bf16.mxu0 %v2448_v14 }
  0x83   :  { %2287 = vmatpush3.bf16.msra.mxu1 %v2883_v39 }
  0x84   :  { %1958 = vmatmul.mubr.msk.f32.gmra.mrb[6].mxu0 %vm147_vm0, %v2868_v15  ;;  %2289 = vmatprep.subr.bf16.mxu1 %v2887_v42 }
  0x85   :  { %1963 = vmatpush3.bf16.msra.mxu0 %v2448_v14  ;;  %1976 = vmatprep.mubr.bf16.mxu0 %v2260_v3  ;;  %v2468_v14 = vld [vmem:[#allocation8 + $0xa8] sm:$0xff]  }
  0x86   :  { %1964 = vmatprep.subr.bf16.mxu0 %v2449_v16 }
  0x87   :  { %2291 = vmatpush3.bf16.msra.mxu1 %v2887_v42 }
  0x88   :  { %2293 = vmatprep.subr.bf16.mxu1 %v2891_v45 }
  0x89   :  { %1965 = vmatpush3.bf16.msra.mxu0 %v2449_v16  ;;  %v2469_v16 = vld [vmem:[#allocation8 + $0xb0] sm:$0xff]  }
  0x8a   :  { %1966 = vmatprep.subr.bf16.mxu0 %v2450_v17 }
  0x8b   :  { %2295 = vmatpush3.bf16.msra.mxu1 %v2891_v45 }
  0x8c   :  { %2297 = vmatprep.subr.bf16.mxu1 %v2895_v48 }
  0x8d   :  { %1967 = vmatpush3.bf16.msra.mxu0 %v2450_v17  ;;  %v2470_v17 = vld [vmem:[#allocation8 + $0xb8] sm:$0xff]  }
  0x8e   :  { %1968 = vmatprep.subr.bf16.mxu0 %v2451_v18 }
  0x8f   :  { %2299 = vmatpush3.bf16.msra.mxu1 %v2895_v48 }
  0x90   :  { %2301 = vmatprep.subr.bf16.mxu1 %v2899_v51 }
  0x91   :  { %1969 = vmatpush3.bf16.msra.mxu0 %v2451_v18 }
  0x92   :  { %1970 = vmatprep.subr.bf16.mxu0 %v2452_v19 }
  0x93   :  { %2303 = vmatpush3.bf16.msra.mxu1 %v2899_v51 }
  0x94   :  { %2305 = vmatprep.subr.bf16.mxu1 %v2903_v54 }
  0x95   :  { %1971 = vmatpush3.bf16.msra.mxu0 %v2452_v19 }
  0x96   :  { %1972 = vmatprep.subr.bf16.mxu0 %v2453_v20 }
  0x97   :  { %2307 = vmatpush3.bf16.msra.mxu1 %v2903_v54 }
  0x98   :  { %2309 = vmatprep.subr.bf16.mxu1 %v2876_v34 }
  0x99   :  { %1973 = vmatpush3.bf16.msra.mxu0 %v2453_v20 }
  0x9a   :  { %1974 = vmatprep.subr.bf16.mxu0 %v2454_v21 }
  0x9d   :  { %1975 = vmatpush3.bf16.msra.mxu0 %v2454_v21 }
  0x9e   :  { %1980 = vmatprep.subr.bf16.mxu0 %v2455_v22 }
  0xa0   :  { %1977 = vmatmul.mubr.bf16.vlgmr.msra.gmra.mrb[8].mxu0 %v2264_v6 }
  0xa1   :  { %1981 = vmatpush3.bf16.msra.mxu0 %v2455_v22 }
  0xa2   :  { %1982 = vmatprep.subr.bf16.mxu0 %v2456_v23 }
  0xa5   :  { %1983 = vmatpush3.bf16.msra.mxu0 %v2456_v23 }
  0xa6   :  { %1984 = vmatprep.subr.bf16.mxu0 %v2457_v24 }
  0xa9   :  { %1985 = vmatpush3.bf16.msra.mxu0 %v2457_v24 }
  0xaa   :  { %1986 = vmatprep.subr.bf16.mxu0 %v2458_v25 }
  0xad   :  { %1987 = vmatpush3.bf16.msra.mxu0 %v2458_v25 }
  0xae   :  { %1988 = vmatprep.subr.bf16.mxu0 %v2459_v26 }
  0xb1   :  { %1989 = vmatpush3.bf16.msra.mxu0 %v2459_v26 }
  0xb2   :  { %1990 = vmatprep.subr.bf16.mxu0 %v2460_v27 }
  0xb5   :  { %1991 = vmatpush3.bf16.msra.mxu0 %v2460_v27 }
  0xb6   :  { %1992 = vmatprep.subr.bf16.mxu0 %v2461_v28 }
  0xb9   :  { %1993 = vmatpush3.bf16.msra.mxu0 %v2461_v28 }
  0xba   :  { %1994 = vmatprep.subr.bf16.mxu0 %v2462_v29 }
  0xbd   :  { %1995 = vmatpush3.bf16.msra.mxu0 %v2462_v29 }
  0xbe   :  { %2000 = vmatprep.subr.bf16.mxu0 %v2463_v30 }
 0x14b   :  { %v1942_v55 = vpop.f32.mrb[0].mxu0 }
 0x14c   :  { %v226_v56 = vpop.f32.mrb[1].mxu0 }
 0x14d   :  { %v342_v57 = vpack.c.bf16 %v1942_v55, %v226_v56 }
 0x14f   :  { %v1945_v58 = vpop.f32.mrb[2].mxu0  ;;  %1996 = vmatprep.mubr.bf16.mxu0 %v342_v57 }
 0x150   :  { %v236_v59 = vpop.f32.mrb[3].mxu0 }
 0x151   :  { %v343_v60 = vpack.c.bf16 %v1945_v58, %v236_v59 }
 0x153   :  { %1997 = vmatmul.mubr.bf16.vlgmr.msra.gmra.mrb[8].mxu0 %v343_v60  ;;  %v1956_v62 = vpop.f32.mrb[4].mxu0 }
 0x154   :  { %2001 = vmatpush3.bf16.msra.mxu0 %v2463_v30  ;;  %v323_v63 = vpop.f32.mrb[5].mxu0 }
 0x155   :  { %2002 = vmatprep.subr.bf16.mxu0 %v2464_v61  ;;  %v573_v1 = vpack.c.bf16 %v1956_v62, %v323_v63 }
 0x157   :  { %v1959_v2 = vpop.f32.mrb[6].mxu0  ;;  %2016 = vmatprep.mubr.bf16.mxu0 %v573_v1 }
 0x158   :  { %2003 = vmatpush3.bf16.msra.mxu0 %v2464_v61  ;;  %v333_v3 = vpop.f32.mrb[7].mxu0 }
 0x159   :  { %2004 = vmatprep.subr.bf16.mxu0 %v2465_v0  ;;  %v574_v6 = vpack.c.bf16 %v1959_v2, %v333_v3  ;;  %v889_v2 = vld [vmem:[%s3059_s6] sm:$0x1] }
 0x15c   :  { %2005 = vmatpush3.bf16.msra.mxu0 %v2465_v0  ;;  %v897_v0 = vlaneseq }
 0x15d   :  { %2006 = vmatprep.subr.bf16.mxu0 %v2466_v4 }
 0x15e   :  { %v898_v1 = vshrl.u32 %v897_v0, 7 }
 0x160   :  { %2007 = vmatpush3.bf16.msra.mxu0 %v2466_v4  ;;  %v2966_v3 = vsub.s32 0, %v898_v1  ;;  %v2491_v1 = vld [vmem:[#allocation10 + $0xa0] sm:$0xff]  }
 0x161   :  { %2008 = vmatprep.subr.bf16.mxu0 %v2467_v11 }
 0x164   :  { %2009 = vmatpush3.bf16.msra.mxu0 %v2467_v11  ;;  %v893_v11 = vld [vmem:[%s3060_s7] sm:$0x1] }
 0x165   :  { %2010 = vmatprep.subr.bf16.mxu0 %v2468_v14 }
 0x168   :  { %2011 = vmatpush3.bf16.msra.mxu0 %v2468_v14 }
 0x169   :  { %2012 = vmatprep.subr.bf16.mxu0 %v2469_v16 }
 0x16c   :  { %2013 = vmatpush3.bf16.msra.mxu0 %v2469_v16 }
 0x16d   :  { %2014 = vmatprep.subr.bf16.mxu0 %v2470_v17 }
 0x170   :  { %2015 = vmatpush3.bf16.msra.mxu0 %v2470_v17 }
 0x171   :  { %2357 = vmatprep.subr.bf16.mxu0 %v2876_v34 }
 0x173   :  { %2017 = vmatmul.mubr.bf16.vlgmr.msra.gmra.mrb[8].mxu0 %v574_v6 }
 0x174   :  { %2359 = vmatpush3.bf16.msra.mxu0 %v2876_v34 }
 0x175   :  { %2361 = vmatprep.subr.bf16.mxu0 %v2878_v36 }
 0x178   :  { %2363 = vmatpush3.bf16.msra.mxu0 %v2878_v36 }
 0x179   :  { %2365 = vmatprep.subr.bf16.mxu0 %v2883_v39 }
 0x17c   :  { %2367 = vmatpush3.bf16.msra.mxu0 %v2883_v39 }
 0x17d   :  { %2369 = vmatprep.subr.bf16.mxu0 %v2887_v42 }
 0x180   :  { %2371 = vmatpush3.bf16.msra.mxu0 %v2887_v42 }
 0x181   :  { %2373 = vmatprep.subr.bf16.mxu0 %v2891_v45 }
 0x184   :  { %2375 = vmatpush3.bf16.msra.mxu0 %v2891_v45 }
 0x185   :  { %2377 = vmatprep.subr.bf16.mxu0 %v2895_v48 }
 0x188   :  { %2379 = vmatpush3.bf16.msra.mxu0 %v2895_v48 }
 0x189   :  { %2381 = vmatprep.subr.bf16.mxu0 %v2899_v51 }
 0x18c   :  { %2383 = vmatpush3.bf16.msra.mxu0 %v2899_v51 }
 0x18d   :  { %2385 = vmatprep.subr.bf16.mxu0 %v2903_v54 }
 0x190   :  { %2387 = vmatpush3.bf16.msra.mxu0 %v2903_v54 }
 0x191   :  { %2389 = vmatprep.subr.bf16.mxu0 %v2876_v34 }
 0x246   :  { %v2926_v18 = vpop.f32.mrb[8].mxu0 }
 0x247   :  { %v2928_v19 = vpop.f32.mrb[9].mxu0  ;;  %v789_v24 = vmul.f32 %v2926_v18, %v2926_v18 }
 0x248   :  { %v2930_v20 = vpop.f32.mrb[10].mxu0  ;;  %2052 = vmatprep.mubr.f32.mxu1 %v2928_v19  ;;  %v787_v22 = vmul.f32 %v2928_v19, %v2928_v19 }
 0x249   :  { %v2933_v21 = vpop.f32.mrb[11].mxu0  ;;  %v790_v25 = vmul.f32 %v2930_v20, %v2930_v20 }
 0x24a   :  { %2053 = vmatmul.mubr.f32.vlgmr.msra.gmra.mrb[0].mxu1 %v2933_v21  ;;  %v788_v23 = vmul.f32 %v2933_v21, %v2933_v21 }
 0x24b   :  { %2311 = vmatpush3.bf16.msra.mxu1 %v2876_v34  ;;  %2055 = vmatprep.mubr.f32.mxu1 %v2926_v18 }
 0x24c   :  { %2313 = vmatprep.subr.bf16.mxu1 %v2878_v36 }
 0x24e   :  { %2056 = vmatmul.mubr.f32.gmra.mrb[2].mxu1 %v2930_v20 }
 0x24f   :  { %2315 = vmatpush3.bf16.msra.mxu1 %v2878_v36  ;;  %2090 = vmatprep.mubr.f32.mxu1 %v787_v22 }
 0x250   :  { %2317 = vmatprep.subr.bf16.mxu1 %v2883_v39 }
 0x253   :  { %2319 = vmatpush3.bf16.msra.mxu1 %v2883_v39 }
 0x254   :  { %2321 = vmatprep.subr.bf16.mxu1 %v2887_v42 }
 0x257   :  { %2323 = vmatpush3.bf16.msra.mxu1 %v2887_v42 }
 0x258   :  { %2325 = vmatprep.subr.bf16.mxu1 %v2891_v45 }
 0x25b   :  { %2327 = vmatpush3.bf16.msra.mxu1 %v2891_v45 }
 0x25c   :  { %2329 = vmatprep.subr.bf16.mxu1 %v2895_v48 }
 0x25f   :  { %2331 = vmatpush3.bf16.msra.mxu1 %v2895_v48 }
 0x260   :  { %2333 = vmatprep.subr.bf16.mxu1 %v2899_v51 }
 0x263   :  { %2335 = vmatpush3.bf16.msra.mxu1 %v2899_v51 }
 0x264   :  { %2337 = vmatprep.subr.bf16.mxu1 %v2903_v54 }
 0x267   :  { %2339 = vmatpush3.bf16.msra.mxu1 %v2903_v54 }
 0x26a   :  { %2091 = vmatmul.mubr.f32.vlgmr.msra.gmra.mrb[4].mxu1 %v788_v23 }
 0x26b   :  { %2093 = vmatprep.mubr.f32.mxu1 %v789_v24 }
 0x26e   :  { %2094 = vmatmul.mubr.f32.gmra.mrb[6].mxu1 %v790_v25 }
 0x26f   :  { %2104 = vmatprep.mubr.msk.f32.mxu1 %vm147_vm0, %v2844_v5 }
 0x31d   :  { %v2054_v26 = vpop.f32.mrb[0].mxu1 }
 0x31e   :  { %v759_v27 = vpop.f32.mrb[1].mxu1 }
 0x31f   :  { %v778_v28 = vadd.f32 %v2054_v26, %v759_v27 }
 0x321   :  { %v2057_v29 = vpop.f32.mrb[2].mxu1 }
 0x322   :  { %v769_v30 = vpop.f32.mrb[3].mxu1 }
 0x323   :  { %v779_v31 = vadd.f32 %v778_v28, %v769_v30 }
 0x325   :  { %v780_v32 = vadd.f32 %v2057_v29, %v779_v31 }
 0x327   :  { %v781_v33 = vrot.slane %v780_v32, 4 }
 0x329   :  { %v782_v35 = vadd.f32 %v781_v33, %v780_v32 }
 0x32b   :  { %v783_v40 = vrot.slane %v782_v35, 2 }
 0x32d   :  { %v784_v46 = vadd.f32 %v783_v40, %v782_v35  ;;  %v2482_v40 = vld [vmem:[#allocation10 + $0x18] sm:$0xff]  }
 0x32f   :  { %v785_v50 = vrot.slane %v784_v46, 1 }
 0x331   :  { %v786_v53 = vadd.f32 %v785_v50, %v784_v46  ;;  %v2486_v46 = vld [vmem:[#allocation10 + $0x38] sm:$0xff]  }
 0x333   :  { %v885_v57 = vmul.f32 0.001953125, %v786_v53 }
 0x335   :  { %v887_v60 = vmul.f32 %v885_v57, %v885_v57 }
 0x33d   :  { %v2092_v37 = vpop.f32.mrb[4].mxu1 }
 0x33e   :  { %v857_v38 = vpop.f32.mrb[5].mxu1 }
 0x33f   :  { %v876_v41 = vadd.f32 %v2092_v37, %v857_v38 }
 0x341   :  { %v2095_v43 = vpop.f32.mrb[6].mxu1 }
 0x342   :  { %v867_v44 = vpop.f32.mrb[7].mxu1 }
 0x343   :  { %v877_v47 = vadd.f32 %v876_v41, %v867_v44  ;;  %v2483_v41 = vld [vmem:[#allocation10 + $0x20] sm:$0xff]   ;;  %v2485_v44 = vld [vmem:[#allocation10 + $0x30] sm:$0xff]  }
 0x345   :  { %v878_v49 = vadd.f32 %v2095_v43, %v877_v47  ;;  %v2484_v43 = vld [vmem:[#allocation10 + $0x28] sm:$0xff]   ;;  %v2487_v47 = vld [vmem:[#allocation10 + $0x80] sm:$0xff]  }
 0x347   :  { %v879_v5 = vrot.slane %v878_v49, 4 }
 0x349   :  { %v880_v52 = vadd.f32 %v879_v5, %v878_v49 }
 0x34b   :  { %v881_v55 = vrot.slane %v880_v52, 2 }
 0x34d   :  { %v882_v56 = vadd.f32 %v881_v55, %v880_v52 }
 0x34f   :  { %v883_v58 = vrot.slane %v882_v56, 1 }
 0x351   :  { %v884_v59 = vadd.f32 %v883_v58, %v882_v56  ;;  %v2488_v56 = vld [vmem:[#allocation10 + $0x88] sm:$0xff]  }
 0x353   :  { %v886_v61 = vmul.f32 0.001953125, %v884_v59  ;;  %v2489_v59 = vld [vmem:[#allocation10 + $0x90] sm:$0xff]  }
 0x355   :  { %v888_v62 = vsub.f32 %v886_v61, %v887_v60 }
 0x357   :  { %v890_v63 = vadd.f32 1e-05, %v888_v62 }
 0x359   :  { %2495 = vrsqrt.f32 %v890_v63  ;;  %v2490_v63 = vld [vmem:[#allocation10 + $0x98] sm:$0xff]  }
 0x363   :  { %v2496_v4 = vpop.eup %2495 }
 0x364   :  { %v892_v6 = vmul.f32 %v2496_v4, %v889_v2  ;;  %v2492_v2 = vld [vmem:[#allocation10 + $0xa8] sm:$0xff]   ;;  %v2493_v4 = vld [vmem:[#allocation10 + $0xb0] sm:$0xff]  }
 0x366   :  { %v894_v14 = vmul.f32 %v892_v6, %v885_v57  ;;  %v900_v16 = vrot.slane %v892_v6, %v2966_v3  ;;  %v2494_v6 = vld [vmem:[#allocation10 + $0xb8] sm:$0xff]  }
 0x368   :  { %v895_v17 = vsub.f32 %v893_v11, %v894_v14  ;;  %v902_v22 = vmul.f32 %v900_v16, %v2928_v19  ;;  %v903_v23 = vmul.f32 %v900_v16, %v2933_v21  ;;  %v904_v24 = vmul.f32 %v2926_v18, %v900_v16  ;;  %v2471_v18 = vld [vmem:[#allocation10 + $0x40] sm:$0xff]   ;;  %v2472_v19 = vld [vmem:[#allocation10 + $0x48] sm:$0xff]   ;;  %v2481_v21 = vld [vmem:[#allocation10 + $0x10] sm:$0xff]  }
 0x369   :  { %v905_v25 = vmul.f32 %v2930_v20, %v900_v16  ;;  %v2479_v20 = vld [vmem:[#allocation10] sm:$0xff]  }
 0x36a   :  { %v910_v26 = vrot.slane %v895_v17, %v2966_v3 }
 0x36c   :  { %v912_v27 = vadd.f32 %v910_v26, %v902_v22  ;;  %v913_v28 = vadd.f32 %v910_v26, %v903_v23  ;;  %v914_v29 = vadd.f32 %v910_v26, %v904_v24  ;;  %v915_v30 = vadd.f32 %v910_v26, %v905_v25 }
 0x36e   :  { %v916_v31 = vmax.f32 %v912_v27, 0.0  ;;  %v917_v32 = vmax.f32 %v913_v28, 0.0  ;;  %v918_v33 = vmax.f32 %v914_v29, 0.0  ;;  %v919_v35 = vmax.f32 %v915_v30, 0.0 }
 0x370   :  { %v2340_v37 = vpack.c.bf16 %v917_v32, %v916_v31  ;;  %v2344_v38 = vpack.c.bf16 %v919_v35, %v918_v33 }
 0x372   :  { %2341 = vmatprep.subr.bf16.mxu1 %v2340_v37 }
 0x373   :  { %2343 = vmatpush3.bf16.msra.mxu1 %v2340_v37 }
 0x374   :  { %2345 = vmatprep.subr.bf16.mxu1 %v2344_v38 }
 0x377   :  { %2347 = vmatpush3.bf16.msra.mxu1 %v2344_v38 }
 0x378   :  { %2349 = vmatprep.subr.bf16.mxu1 %v2340_v37 }
 0x37a   :  { %2105 = vmatmul.mubr.msk.f32.vlgmr.msra.gmra.mrb[8].mxu1 %vm147_vm0, %v2848_v7  ;;  %v2473_v7 = vld [vmem:[#allocation10 + $0x50] sm:$0xff]  }
 0x37b   :  { %2351 = vmatpush3.bf16.msra.mxu1 %v2340_v37  ;;  %2107 = vmatprep.mubr.msk.f32.mxu1 %vm147_vm0, %v2850_v8  ;;  %v2474_v8 = vld [vmem:[#allocation10 + $0x58] sm:$0xff]  }
 0x37c   :  { %2353 = vmatprep.subr.bf16.mxu1 %v2344_v38 }
 0x37e   :  { %2108 = vmatmul.mubr.msk.f32.gmra.mrb[10].mxu1 %vm147_vm0, %v2854_v9  ;;  %v2475_v9 = vld [vmem:[#allocation10 + $0x60] sm:$0xff]  }
 0x37f   :  { %2355 = vmatpush3.bf16.msra.mxu1 %v2344_v38  ;;  %2118 = vmatprep.mubr.msk.f32.mxu1 %vm147_vm0, %v2858_v10  ;;  %v2476_v10 = vld [vmem:[#allocation10 + $0x68] sm:$0xff]  }
 0x380   :  { %2124 = vmatprep.subr.bf16.mxu1 %v2471_v18 }
 0x382   :  { %2119 = vmatmul.mubr.msk.f32.vlgmr.msra.gmra.mrb[12].mxu1 %vm147_vm0, %v2862_v12  ;;  %v2477_v12 = vld [vmem:[#allocation10 + $0x70] sm:$0xff]  }
 0x383   :  { %2125 = vmatpush3.bf16.msra.mxu1 %v2471_v18  ;;  %2121 = vmatprep.mubr.msk.f32.mxu1 %vm147_vm0, %v2866_v13  ;;  %v2478_v13 = vld [vmem:[#allocation10 + $0x78] sm:$0xff]  }
 0x384   :  { %2126 = vmatprep.subr.bf16.mxu1 %v2472_v19 }
 0x386   :  { %2122 = vmatmul.mubr.msk.f32.gmra.mrb[14].mxu1 %vm147_vm0, %v2868_v15  ;;  %v2480_v15 = vld [vmem:[#allocation10 + $0x8] sm:$0xff]  }
 0x387   :  { %2127 = vmatpush3.bf16.msra.mxu1 %v2472_v19  ;;  %2140 = vmatprep.mubr.bf16.mxu1 %v2340_v37 }
 0x388   :  { %2128 = vmatprep.subr.bf16.mxu1 %v2473_v7 }
 0x38b   :  { %2129 = vmatpush3.bf16.msra.mxu1 %v2473_v7 }
 0x38c   :  { %2130 = vmatprep.subr.bf16.mxu1 %v2474_v8 }
 0x38f   :  { %2131 = vmatpush3.bf16.msra.mxu1 %v2474_v8 }
 0x390   :  { %2132 = vmatprep.subr.bf16.mxu1 %v2475_v9 }
 0x393   :  { %2133 = vmatpush3.bf16.msra.mxu1 %v2475_v9 }
 0x394   :  { %2134 = vmatprep.subr.bf16.mxu1 %v2476_v10 }
 0x397   :  { %2135 = vmatpush3.bf16.msra.mxu1 %v2476_v10 }
 0x398   :  { %2136 = vmatprep.subr.bf16.mxu1 %v2477_v12 }
 0x39b   :  { %2137 = vmatpush3.bf16.msra.mxu1 %v2477_v12 }
 0x39c   :  { %2138 = vmatprep.subr.bf16.mxu1 %v2478_v13 }
 0x39f   :  { %2139 = vmatpush3.bf16.msra.mxu1 %v2478_v13 }
 0x3a0   :  { %2144 = vmatprep.subr.bf16.mxu1 %v2479_v20 }
 0x3a2   :  { %2141 = vmatmul.mubr.bf16.vlgmr.msra.gmra.mrb[16].mxu1 %v2344_v38 }
 0x3a3   :  { %2145 = vmatpush3.bf16.msra.mxu1 %v2479_v20 }
 0x3a4   :  { %2146 = vmatprep.subr.bf16.mxu1 %v2480_v15 }
 0x3a7   :  { %2147 = vmatpush3.bf16.msra.mxu1 %v2480_v15 }
 0x3a8   :  { %2148 = vmatprep.subr.bf16.mxu1 %v2481_v21 }
 0x3ab   :  { %2149 = vmatpush3.bf16.msra.mxu1 %v2481_v21 }
 0x3ac   :  { %2150 = vmatprep.subr.bf16.mxu1 %v2482_v40 }
 0x3af   :  { %2151 = vmatpush3.bf16.msra.mxu1 %v2482_v40 }
 0x3b0   :  { %2152 = vmatprep.subr.bf16.mxu1 %v2483_v41 }
 0x3b3   :  { %2153 = vmatpush3.bf16.msra.mxu1 %v2483_v41  ;;  %v1637_v41 = vld [vmem:[%s3061_s8] sm:$0x1]  ;;  %s2677_s8 = smov [#allocation13]  }
 0x3b4   :  { %2154 = vmatprep.subr.bf16.mxu1 %v2484_v43 }
 0x3b7   :  { %2155 = vmatpush3.bf16.msra.mxu1 %v2484_v43 }
 0x3b8   :  { %2156 = vmatprep.subr.bf16.mxu1 %v2485_v44 }
 0x3bb   :  { %2157 = vmatpush3.bf16.msra.mxu1 %v2485_v44 }
 0x3bc   :  { %2158 = vmatprep.subr.bf16.mxu1 %v2486_v46 }
 0x3bf   :  { %2159 = vmatpush3.bf16.msra.mxu1 %v2486_v46  ;;  %v1641_v46 = vld [vmem:[%s3062_s9] sm:$0x1]  ;;  %s1681_s9 = sshll.u32 %s2677_s8, 4  ;;  %s1682_s9 = int_to_ptr.vmem [resolvable:$true] %s1681_s9 }
 0x3c0   :  { %2164 = vmatprep.subr.bf16.mxu1 %v2487_v47  ;;  %s2635_s16 = scalar_lea.vmem %s1682_s9, 512  ;;  %p2640_p7 = scmp.lt.s32.totalorder %s1682_s9, %s1682_s9 }
 0x3c1   :  { %p2636_p6 = scmp.ne.s32.totalorder %s1682_s9, %s2635_s16  ;;  %p2641_p8 = scmp.lt.s32.totalorder %s2635_s16, %s2635_s16 }
 0x3c3   :  { %p2642_p9 = por %p2641_p8, %p2640_p7 }
 0x3c5   :  { %p2643_p10 = pnand %p2642_p9, %p2636_p6 }
 0x44d   :  { %v2106_v49 = vpop.f32.mrb[8].mxu1 }
 0x44e   :  { %v986_v50 = vpop.f32.mrb[9].mxu1 }
 0x44f   :  { %v1090_v5 = vpack.c.bf16 %v2106_v49, %v986_v50 }
 0x451   :  { %v2109_v52 = vpop.f32.mrb[10].mxu1  ;;  %2160 = vmatprep.mubr.bf16.mxu1 %v1090_v5 }
 0x452   :  { %v996_v53 = vpop.f32.mrb[11].mxu1 }
 0x453   :  { %v1091_v55 = vpack.c.bf16 %v2109_v52, %v996_v53 }
 0x455   :  { %2161 = vmatmul.mubr.bf16.vlgmr.msra.gmra.mrb[16].mxu1 %v1091_v55  ;;  %v2120_v57 = vpop.f32.mrb[12].mxu1 }
 0x456   :  { %2165 = vmatpush3.bf16.msra.mxu1 %v2487_v47  ;;  %v1071_v58 = vpop.f32.mrb[13].mxu1 }
 0x457   :  { %2166 = vmatprep.subr.bf16.mxu1 %v2488_v56  ;;  %v1321_v60 = vpack.c.bf16 %v2120_v57, %v1071_v58 }
 0x459   :  { %v2123_v61 = vpop.f32.mrb[14].mxu1  ;;  %2180 = vmatprep.mubr.bf16.mxu1 %v1321_v60 }
 0x45a   :  { %2167 = vmatpush3.bf16.msra.mxu1 %v2488_v56  ;;  %v1081_v62 = vpop.f32.mrb[15].mxu1 }
 0x45b   :  { %2168 = vmatprep.subr.bf16.mxu1 %v2489_v59  ;;  %v1322_v0 = vpack.c.bf16 %v2123_v61, %v1081_v62  ;;  %v2499_v61 = vld [vmem:[#allocation2] sm:$0xff] }
 0x45e   :  { %2169 = vmatpush3.bf16.msra.mxu1 %v2489_v59 }
 0x45f   :  { %2170 = vmatprep.subr.bf16.mxu1 %v2490_v63 }
 0x462   :  { %2171 = vmatpush3.bf16.msra.mxu1 %v2490_v63  ;;  %v2500_v63 = vld [vmem:[#allocation2 + $0x8] sm:$0xff] }
 0x463   :  { %2172 = vmatprep.subr.bf16.mxu1 %v2491_v1 }
 0x466   :  { %2173 = vmatpush3.bf16.msra.mxu1 %v2491_v1  ;;  %v2501_v1 = vld [vmem:[#allocation2 + $0x10] sm:$0xff] }
 0x467   :  { %2174 = vmatprep.subr.bf16.mxu1 %v2492_v2 }
 0x46a   :  { %2175 = vmatpush3.bf16.msra.mxu1 %v2492_v2 }
 0x46b   :  { %2176 = vmatprep.subr.bf16.mxu1 %v2493_v4 }
 0x46e   :  { %2177 = vmatpush3.bf16.msra.mxu1 %v2493_v4  ;;  %v2502_v4 = vld [vmem:[#allocation2 + $0x18] sm:$0xff] }
 0x46f   :  { %2178 = vmatprep.subr.bf16.mxu1 %v2494_v6 }
 0x472   :  { %2179 = vmatpush3.bf16.msra.mxu1 %v2494_v6 }
 0x475   :  { %2181 = vmatmul.mubr.bf16.vlgmr.msra.gmra.mrb[16].mxu1 %v1322_v0 }
 0x548   :  { %v2991_v11 = vpop.f32.mrb[16].mxu1 }
 0x549   :  { %v2993_v14 = vpop.f32.mrb[17].mxu1 }
 0x54a   :  { %v2995_v16 = vpop.f32.mrb[18].mxu1  ;;  %2216 = vmatprep.mubr.f32.mxu0 %v2993_v14  ;;  %v1535_v22 = vmul.f32 %v2993_v14, %v2993_v14 }
 0x54b   :  { %v2998_v17 = vpop.f32.mrb[19].mxu1 }
 0x54c   :  { %2217 = vmatmul.mubr.f32.vlgmr.msra.gmra.mrb[12].mxu0 %v2998_v17 }
 0x54d   :  { %2391 = vmatpush3.bf16.msra.mxu0 %v2876_v34  ;;  %2219 = vmatprep.mubr.f32.mxu0 %v2991_v11  ;;  %v1536_v34 = vmul.f32 %v2998_v17, %v2998_v17 }
 0x54e   :  { %2393 = vmatprep.subr.bf16.mxu0 %v2878_v36 }
 0x550   :  { %2220 = vmatmul.mubr.f32.gmra.mrb[14].mxu0 %v2995_v16 }
 0x551   :  { %2395 = vmatpush3.bf16.msra.mxu0 %v2878_v36  ;;  %2254 = vmatprep.mubr.f32.mxu0 %v1535_v22  ;;  %v1537_v36 = vmul.f32 %v2991_v11, %v2991_v11 }
 0x552   :  { %2397 = vmatprep.subr.bf16.mxu0 %v2883_v39 }
 0x555   :  { %2399 = vmatpush3.bf16.msra.mxu0 %v2883_v39  ;;  %v1538_v39 = vmul.f32 %v2995_v16, %v2995_v16 }
 0x556   :  { %2401 = vmatprep.subr.bf16.mxu0 %v2887_v42 }
 0x559   :  { %2403 = vmatpush3.bf16.msra.mxu0 %v2887_v42 }
 0x55a   :  { %2405 = vmatprep.subr.bf16.mxu0 %v2891_v45 }
 0x55d   :  { %2407 = vmatpush3.bf16.msra.mxu0 %v2891_v45 }
 0x55e   :  { %2409 = vmatprep.subr.bf16.mxu0 %v2895_v48 }
 0x561   :  { %2411 = vmatpush3.bf16.msra.mxu0 %v2895_v48 }
 0x562   :  { %2413 = vmatprep.subr.bf16.mxu0 %v2899_v51 }
 0x565   :  { %2415 = vmatpush3.bf16.msra.mxu0 %v2899_v51 }
 0x566   :  { %2417 = vmatprep.subr.bf16.mxu0 %v2903_v54 }
 0x569   :  { %2419 = vmatpush3.bf16.msra.mxu0 %v2903_v54 }
 0x56c   :  { %2255 = vmatmul.mubr.f32.vlgmr.msra.gmra.mrb[16].mxu0 %v1536_v34 }
 0x56d   :  { %2257 = vmatprep.mubr.f32.mxu0 %v1537_v36 }
 0x570   :  { %2258 = vmatmul.mubr.f32.gmra.mrb[18].mxu0 %v1538_v39 }
 0x61f   :  { %v2218_v42 = vpop.f32.mrb[12].mxu0 }
 0x620   :  { %v1507_v45 = vpop.f32.mrb[13].mxu0 }
 0x621   :  { %v1526_v48 = vadd.f32 %v2218_v42, %v1507_v45 }
 0x623   :  { %v2221_v51 = vpop.f32.mrb[14].mxu0 }
 0x624   :  { %v1517_v23 = vpop.f32.mrb[15].mxu0 }
 0x625   :  { %v1527_v24 = vadd.f32 %v1526_v48, %v1517_v23 }
 0x627   :  { %v1528_v25 = vadd.f32 %v2221_v51, %v1527_v24 }
 0x629   :  { %v1529_v54 = vrot.slane %v1528_v25, 4 }
 0x62b   :  { %v1530_v26 = vadd.f32 %v1529_v54, %v1528_v25 }
 0x62d   :  { %v1531_v29 = vrot.slane %v1530_v26, 2 }
 0x62f   :  { %v1532_v33 = vadd.f32 %v1531_v29, %v1530_v26 }
 0x631   :  { %v1533_v38 = vrot.slane %v1532_v33, 1 }
 0x633   :  { %v1534_v7 = vadd.f32 %v1533_v38, %v1532_v33 }
 0x635   :  { %v1633_v10 = vmul.f32 0.001953125, %v1534_v7 }
 0x637   :  { %v1635_v20 = vmul.f32 %v1633_v10, %v1633_v10 }
 0x63f   :  { %v2256_v27 = vpop.f32.mrb[16].mxu0 }
 0x640   :  { %v1605_v28 = vpop.f32.mrb[17].mxu0 }
 0x641   :  { %v1624_v30 = vadd.f32 %v2256_v27, %v1605_v28 }
 0x643   :  { %v2259_v31 = vpop.f32.mrb[18].mxu0 }
 0x644   :  { %v1615_v32 = vpop.f32.mrb[19].mxu0 }
 0x645   :  { %v1625_v35 = vadd.f32 %v1624_v30, %v1615_v32 }
 0x647   :  { %v1626_v37 = vadd.f32 %v2259_v31, %v1625_v35 }
 0x649   :  { %v1627_v18 = vrot.slane %v1626_v37, 4 }
 0x64b   :  { %v1628_v19 = vadd.f32 %v1627_v18, %v1626_v37 }
 0x64d   :  { %v1629_v8 = vrot.slane %v1628_v19, 2 }
 0x64f   :  { %v1630_v9 = vadd.f32 %v1629_v8, %v1628_v19 }
 0x651   :  { %v1631_v12 = vrot.slane %v1630_v9, 1 }
 0x653   :  { %v1632_v13 = vadd.f32 %v1631_v12, %v1630_v9 }
 0x655   :  { %v1634_v15 = vmul.f32 0.001953125, %v1632_v13 }
 0x657   :  { %v1636_v21 = vsub.f32 %v1634_v15, %v1635_v20 }
 0x659   :  { %v1638_v40 = vadd.f32 1e-05, %v1636_v21 }
 0x65b   :  { %2497 = vrsqrt.f32 %v1638_v40 }
 0x665   :  { %v2498_v43 = vpop.eup %2497 }
 0x666   :  { %v1640_v44 = vmul.f32 %v2498_v43, %v1637_v41 }
 0x668   :  { %v1642_v47 = vmul.f32 %v1640_v44, %v1633_v10  ;;  %v1648_v49 = vrot.slane %v1640_v44, %v2966_v3 }
 0x66a   :  { %v1643_v50 = vsub.f32 %v1641_v46, %v1642_v47  ;;  %v1650_v5 = vmul.f32 %v1648_v49, %v2993_v14  ;;  %v1651_v52 = vmul.f32 %v1648_v49, %v2998_v17  ;;  %v1652_v53 = vmul.f32 %v2991_v11, %v1648_v49 }
 0x66b   :  { %v1653_v55 = vmul.f32 %v2995_v16, %v1648_v49 }
 0x66c   :  { %v1658_v56 = vrot.slane %v1643_v50, %v2966_v3 }
 0x66e   :  { %v1660_v57 = vadd.f32 %v1658_v56, %v1650_v5  ;;  %v1661_v58 = vadd.f32 %v1658_v56, %v1651_v52  ;;  %v1662_v59 = vadd.f32 %v1658_v56, %v1652_v53  ;;  %v1663_v60 = vadd.f32 %v1658_v56, %v1653_v55 }
 0x670   :  { %v1664_v62 = vadd.f32 %v2499_v61, %v1660_v57  ;;  %v1665_v0 = vadd.f32 %v2500_v63, %v1661_v58  ;;  %v1666_v2 = vadd.f32 %v2501_v1, %v1662_v59  ;;  %v1667_v6 = vadd.f32 %v2502_v4, %v1663_v60 }
 0x672   :  { %v1668_v14 = vmax.f32 %v1664_v62, 0.0  ;;  %v1669_v11 = vmax.f32 %v1665_v0, 0.0  ;;  %v1670_v17 = vmax.f32 %v1666_v2, 0.0  ;;  %v1671_v16 = vmax.f32 %v1667_v6, 0.0 }
 0x674   :  { %1672 = vst [vmem:[#allocation13] sm:$0xff] %v1668_v14  ;;  %1673 = vst [vmem:[#allocation13 + $0x8] sm:$0xff] %v1669_v11 }
 0x675   :  { %1674 = vst [vmem:[#allocation13 + $0x10] sm:$0xff] %v1670_v17  ;;  %1675 = vst [vmem:[#allocation13 + $0x18] sm:$0xff] %v1671_v16 }
 0x676   :  { %2646 = shalt.err (!%p2643_p10)
}
 0x677   :  { %s2647_s18 = scalar_lea.hbm %s3063_s10, 512 }
 0x678   :  { %p2648_p11 = scmp.ne.s32.totalorder %s3063_s10, %s2647_s18  ;;  %p2651_p12 = scmp.lt.u32.totalorder %s2647_s18, %s3063_s10 }
 0x67a   :  { %p2653_p13 = pnand %p2651_p12, %p2648_p11 }
 0x67c   :  { %2656 = shalt.err (!%p2653_p13)
}
 0x67d   :  { %1687 = dma.vmem_to_hbm [thread:$0]  %s1682_s9, 512, %s3063_s10, [#allocation4], %s2669_s25, %s2669_s25, %s2670_s26  }
 0x67e   :  { %2665 = dma.done.wait [#allocation4], 512  }
 0x67f   :  { %2666 = vsyncadd [#allocation4], 4294966784 }
 0x680   :  { %1691 = vsyncpa [#allocation3], 1 }
 0x681   :  { %1692 = vsyncpa [#allocation6], 1 }
 0x682   :  { %1693 = vsyncpa [#allocation9], 1 }
 0x683   :  { %1694 = vsyncpa [#allocation12], 1 }
 0x684   :  { %1695 = vsyncpa [#allocation4], 1 }

</bundles_post_ra>
